<compile_context>
chip_gen: v5e
topology: v5e:2x2
jax: 0.10.0
libtpu: 0.0.40
codegen_flags: <defaults>
</compile_context>

<pallas_src>
import math
import functools

import jax
import jax.numpy as jnp
from jax.experimental import pallas as pl
from jax.experimental.pallas import tpu as pltpu


def make_sinusoidal_pe(max_len: int, d_model: int) -> jnp.ndarray:
    """Deterministic sinusoidal table, exactly as in the PyTorch __init__."""
    position = jnp.arange(0, max_len, dtype=jnp.float32)[:, None]         # (L, 1)
    div_term = jnp.exp(
        jnp.arange(0, d_model, 2, dtype=jnp.float32) * (-math.log(10000.0) / d_model)
    )                                                                      # (D/2,)
    pe = jnp.zeros((max_len, d_model), dtype=jnp.float32)
    pe = pe.at[:, 0::2].set(jnp.sin(position * div_term))
    pe = pe.at[:, 1::2].set(jnp.cos(position * div_term))
    return pe                                                              # (L, D)


# --------------------------------------------------------------------------
# Kernels
# --------------------------------------------------------------------------

def _pe_add_kernel(x_ref, pe_ref, out_ref):
    # x_ref: (TS, B, D)   pe_ref: (TS, D)   out_ref: (TS, B, D)
    out_ref[...] = (x_ref[...] + pe_ref[...][:, None, :]).astype(out_ref.dtype)


def _pe_dropout_prng_kernel(seed_ref, x_ref, pe_ref, out_ref, *,
                            threshold: int, scale: float):
    # In-kernel hardware PRNG path (TPU only).
    y = x_ref[...] + pe_ref[...][:, None, :]
    # Unique stream per grid tile; a single seed would repeat the same mask.
    pltpu.prng_seed(seed_ref[0] + pl.program_id(0))
    bits = pltpu.prng_random_bits(y.shape)
    # keep with probability ~(1 - p); pure integer compare on the low 24 bits.
    keep = (bits & 0xFFFFFF) >= threshold
    out_ref[...] = jnp.where(keep, y * scale, 0.0).astype(out_ref.dtype)


def _pe_dropout_bits_kernel(x_ref, pe_ref, bits_ref, out_ref, *,
                            threshold: int, scale: float):
    # Fallback path: random bits are generated outside the kernel.
    y = x_ref[...] + pe_ref[...][:, None, :]
    keep = (bits_ref[...] & 0xFFFFFF) >= threshold
    out_ref[...] = jnp.where(keep, y * scale, 0.0).astype(out_ref.dtype)


# --------------------------------------------------------------------------
# Wrapper
# --------------------------------------------------------------------------

def _pick_tile_s(S: int, B: int, D: int, dtype) -> int:
    """Sequence-tile size targeting ~2 MiB per x block (fits every gen's
    default scoped VMEM with double-buffered in+out)."""
    bytes_per_row = B * D * jnp.dtype(dtype).itemsize
    target = 2 * 1024 * 1024
    rows = max(1, target // max(bytes_per_row, 1))
    if rows >= S:
        return S                                   # full extent -> always legal
    rows = max(8, (rows // 8) * 8)                 # keep pe block sublane-aligned
    return min(rows, S)


def positional_encoding_forward(x, pe_table, *, seed: int = 0,
                                dropout_p: float = 0.1, train: bool = True):
    """x: (seq_len, batch, d_model) -> same shape; x + pe[:S] with dropout."""
    S, B, D = x.shape
    pe_slice = pe_table[:S].astype(x.dtype)        # matches self.pe[:x.size(0)]

    tile_s = _pick_tile_s(S, B, D, x.dtype)
    grid = (pl.cdiv(S, tile_s),)
    x_block = (tile_s, B, D)
    pe_block = (tile_s, D)
    out_shape = jax.ShapeDtypeStruct((S, B, D), x.dtype)

    cparams = pltpu.CompilerParams(
        dimension_semantics=("parallel",),         # megacore-shardable on v7x
        vmem_limit_bytes=64 * 1024 * 1024,
    )

    apply_dropout = bool(train) and float(dropout_p) > 0.0

    if not apply_dropout:
        # Eval / p == 0: plain broadcast add (compile-time branch, no seed arg).
        grid_spec = pltpu.PrefetchScalarGridSpec(
            num_scalar_prefetch=0, grid=grid,
            in_specs=[pl.BlockSpec(x_block, lambda i: (i, 0, 0)),
                      pl.BlockSpec(pe_block, lambda i: (i, 0))],
            out_specs=pl.BlockSpec(x_block, lambda i: (i, 0, 0)),
        )
        return pl.pallas_call(_pe_add_kernel, out_shape=out_shape,
                              grid_spec=grid_spec,
                              compiler_params=cparams)(x, pe_slice)

    p = float(dropout_p)
    if p >= 1.0:
        return jnp.zeros_like(x)
    threshold = int(round(p * (1 << 24)))          # compare on 24-bit uniform ints
    scale = 1.0 / (1.0 - p)

    if jax.default_backend() == "tpu":
        kernel = functools.partial(_pe_dropout_prng_kernel,
                                   threshold=threshold, scale=scale)
        grid_spec = pltpu.PrefetchScalarGridSpec(
            num_scalar_prefetch=1,                 # seed lands in SMEM
            grid=grid,
            in_specs=[pl.BlockSpec(x_block, lambda i, seed_ref: (i, 0, 0)),
                      pl.BlockSpec(pe_block, lambda i, seed_ref: (i, 0))],
            out_specs=pl.BlockSpec(x_block, lambda i, seed_ref: (i, 0, 0)),
        )
        seed_arr = jnp.asarray([seed], dtype=jnp.int32)
        return pl.pallas_call(kernel, out_shape=out_shape,
                              grid_spec=grid_spec,
                              compiler_params=cparams)(seed_arr, x, pe_slice)

    # Non-TPU backend (e.g. CPU interpret checker): pltpu.prng_* has no lowering
    # there, so precompute the random bits and stream them through the kernel.
    bits = jax.random.bits(jax.random.PRNGKey(seed), (S, B, D), dtype=jnp.uint32)
    kernel = functools.partial(_pe_dropout_bits_kernel,
                               threshold=threshold, scale=scale)
    grid_spec = pltpu.PrefetchScalarGridSpec(
        num_scalar_prefetch=0, grid=grid,
        in_specs=[pl.BlockSpec(x_block, lambda i: (i, 0, 0)),
                  pl.BlockSpec(pe_block, lambda i: (i, 0)),
                  pl.BlockSpec(x_block, lambda i: (i, 0, 0))],
        out_specs=pl.BlockSpec(x_block, lambda i: (i, 0, 0)),
    )
    return pl.pallas_call(kernel, out_shape=out_shape,
                          grid_spec=grid_spec,
                          compiler_params=cparams)(x, pe_slice, bits)


if __name__ == "__main__":
    # Small shapes consistent with the module's (seq_len, batch, d_model) input.
    seq_len, batch, d_model = 8, 2, 32
    max_len = 64
    p = 0.1

    key = jax.random.PRNGKey(0)
    x = jax.random.normal(key, (seq_len, batch, d_model), dtype=jnp.float32)
    pe_table = make_sinusoidal_pe(max_len, d_model)

    # Training-mode forward (with dropout).
    out_train = positional_encoding_forward(x, pe_table, seed=0,
                                            dropout_p=p, train=True)
    out_train = jax.block_until_ready(out_train)

    # Eval-mode forward (dropout disabled) -> must equal x + pe exactly.
    out_eval = positional_encoding_forward(x, pe_table, dropout_p=p, train=False)
    out_eval = jax.block_until_ready(out_eval)

    ref = x + pe_table[:seq_len][:, None, :]
    assert out_eval.shape == (seq_len, batch, d_model)
    assert jnp.allclose(out_eval, ref, atol=1e-5), "eval path mismatch"

    # Dropout sanity: every element is either 0 or ref * 1/(1-p).
    scaled = ref * (1.0 / (1.0 - p))
    ok = (jnp.isclose(out_train, scaled, rtol=1e-4, atol=1e-5)
          | jnp.isclose(out_train, 0.0, atol=1e-7))
    assert bool(jnp.all(ok)), "train path mismatch"

    print("KERNEL_OK")
</pallas_src>

<mosaic_0001>
module attributes {stable_mosaic.version = 11 : i64} {
  func.func @_pe_dropout_bits_kernel(%arg0: i32, %arg1: memref<8x2x32xf32, #tpu.memory_space<vmem>>, %arg2: memref<8x32xf32, #tpu.memory_space<vmem>>, %arg3: memref<8x2x32xi32, #tpu.memory_space<vmem>>, %arg4: memref<8x2x32xf32, #tpu.memory_space<vmem>>) attributes {dimension_semantics = [#tpu.dimension_semantics<parallel>], iteration_bounds = array<i64: 1>, scalar_prefetch = 0 : i64, scratch_operands = 0 : i64, tpu.core_type = #tpu.core_type<tc>, window_params = [{transform_indices = @transform_0, window_bounds = array<i64: 8, 2, 32>}, {transform_indices = @transform_1, window_bounds = array<i64: 8, 32>}, {transform_indices = @transform_2, window_bounds = array<i64: 8, 2, 32>}, {transform_indices = @transform_3, window_bounds = array<i64: 8, 2, 32>}]} {
    %c0 = arith.constant 0 : index
    %c0_0 = arith.constant 0 : index
    %c0_1 = arith.constant 0 : index
    %0 = vector.load %arg1[%c0, %c0_0, %c0_1] : memref<8x2x32xf32, #tpu.memory_space<vmem>>, vector<8x2x32xf32>
    %c0_2 = arith.constant 0 : index
    %c0_3 = arith.constant 0 : index
    %1 = vector.load %arg2[%c0_2, %c0_3] : memref<8x32xf32, #tpu.memory_space<vmem>>, vector<8x32xf32>
    %2 = vector.shape_cast %1 : vector<8x32xf32> to vector<8x1x32xf32>
    %3 = vector.broadcast %2 : vector<8x1x32xf32> to vector<8x2x32xf32>
    %4 = arith.addf %0, %3 : vector<8x2x32xf32>
    %c0_4 = arith.constant 0 : index
    %c0_5 = arith.constant 0 : index
    %c0_6 = arith.constant 0 : index
    %5 = vector.load %arg3[%c0_4, %c0_5, %c0_6] : memref<8x2x32xi32, #tpu.memory_space<vmem>>, vector<8x2x32xi32>
    %c16777215_i32 = arith.constant 16777215 : i32
    %6 = vector.broadcast %c16777215_i32 : i32 to vector<8x2x32xi32>
    %7 = arith.andi %5, %6 : vector<8x2x32xi32>
    %c1677722_i32 = arith.constant 1677722 : i32
    %8 = vector.broadcast %c1677722_i32 : i32 to vector<8x2x32xi32>
    %9 = arith.cmpi uge, %7, %8 : vector<8x2x32xi32>
    %cst = arith.constant 1.11111116 : f32
    %10 = vector.broadcast %cst : f32 to vector<8x2x32xf32>
    %11 = arith.mulf %4, %10 : vector<8x2x32xf32>
    %cst_7 = arith.constant 0.000000e+00 : f32
    %12 = vector.broadcast %cst_7 : f32 to vector<8x2x32xf32>
    %13 = arith.select %9, %11, %12 : vector<8x2x32xi1>, vector<8x2x32xf32>
    %c0_8 = arith.constant 0 : index
    %c0_9 = arith.constant 0 : index
    %c0_10 = arith.constant 0 : index
    %14 = vector.load %arg4[%c0_8, %c0_9, %c0_10] : memref<8x2x32xf32, #tpu.memory_space<vmem>>, vector<8x2x32xf32>
    tpu.vector_store %arg4[%c0_8, %c0_9, %c0_10], %13 {strides = array<i32>} : memref<8x2x32xf32, #tpu.memory_space<vmem>>, vector<8x2x32xf32>,
    return
  }
  func.func @transform_0(%arg0: i32) -> (i32, i32, i32) {
    %c0_i32 = arith.constant 0 : i32
    %c0_i32_0 = arith.constant 0 : i32
    %c0_i32_1 = arith.constant 0 : i32
    return %arg0, %c0_i32, %c0_i32_0 : i32, i32, i32
  }
  func.func @transform_1(%arg0: i32) -> (i32, i32) {
    %c0_i32 = arith.constant 0 : i32
    %c0_i32_0 = arith.constant 0 : i32
    return %arg0, %c0_i32 : i32, i32
  }
  func.func @transform_2(%arg0: i32) -> (i32, i32, i32) {
    %c0_i32 = arith.constant 0 : i32
    %c0_i32_0 = arith.constant 0 : i32
    %c0_i32_1 = arith.constant 0 : i32
    return %arg0, %c0_i32, %c0_i32_0 : i32, i32, i32
  }
  func.func @transform_3(%arg0: i32) -> (i32, i32, i32) {
    %c0_i32 = arith.constant 0 : i32
    %c0_i32_0 = arith.constant 0 : i32
    %c0_i32_1 = arith.constant 0 : i32
    return %arg0, %c0_i32, %c0_i32_0 : i32, i32, i32
  }
}

</mosaic_0001>

<bundles_post_ra>
// kernel: tpu_custom_call.1
= control target key start
LH: loop header
LB: loop body
LE: loop exit
PB: predicated region body
PF: predicated region fallthrough
CT: control target
= control target key end

     0   :  { %8 = vsyncpa [#allocation3], 0  ;;  %s367_s0 = inlined_call_operand.hbm [shape: f32[8,2,32], index: 0, kind: input, shape index: {}]   ;;  %s368_s1 = inlined_call_operand.hbm [shape: f32[8,32], index: 1, kind: input, shape index: {}]   ;;  %s369_s2 = inlined_call_operand.hbm [shape: u32[8,2,32], index: 2, kind: input, shape index: {}]   ;;  %s370_s3 = inlined_call_operand.hbm [shape: f32[8,2,32], index: 3, kind: output, shape index: {}]  }
   0x1   :  { %9 = vsyncpa [#allocation6], 0  ;;  %s29_s14 = sshll.u32 %s368_s1, 4  ;;  %s30_s14 = int_to_ptr.hbm [resolvable:$true] %s29_s14 }
   0x2   :  { %10 = vsyncpa [#allocation4], 0  ;;  %s302_s15 = smov [#allocation5]   ;;  %s15_s19 = sshll.u32 %s367_s0, 4  ;;  %s16_s19 = int_to_ptr.hbm [resolvable:$true] %s15_s19 }
   0x3   :  { %s31_s16 = sshll.u32 %s302_s15, 4  ;;  %s303_s20 = smov [#allocation2]   ;;  %s32_s16 = int_to_ptr.vmem [resolvable:$true] %s31_s16 }
   0x4   :  { %34 = dma.hbm_to_vmem [thread:$0]  %s30_s14, 128, %s32_s16, [#allocation6]  }
   0x5   :  { %s17_s21 = sshll.u32 %s303_s20, 4  ;;  %s304_s22 = smov 32   ;;  %s18_s21 = int_to_ptr.vmem [resolvable:$true] %s17_s21 }
   0x6   :  { %s305_s23 = smov 2   ;;  %s39_s25 = sshll.u32 %s369_s2, 4  ;;  %s40_s25 = int_to_ptr.hbm [resolvable:$true] %s39_s25 }
   0x7   :  { %23 = dma.hbm_to_vmem [thread:$0]  %s16_s19, 256, %s18_s21, [#allocation3], %s304_s22, %s304_s22, %s305_s23  }
   0x8   :  { %s306_s26 = smov [#allocation7]  }
   0x9   :  { %s41_s27 = sshll.u32 %s306_s26, 4  ;;  %s42_s27 = int_to_ptr.vmem [resolvable:$true] %s41_s27 }
   0xa   :  { %47 = dma.hbm_to_vmem [thread:$0]  %s40_s25, 256, %s42_s27, [#allocation6], %s304_s22, %s304_s22, %s305_s23  }
   0xb   :  { %296 = dma.done.wait [#allocation3], 256  }
   0xc   :  { %297 = vsyncadd [#allocation3], 4294967040 }
   0xd   :  { %298 = dma.done.wait [#allocation6], 384  }
   0xe   :  { %299 = vsyncadd [#allocation6], 4294966912  ;;  %v60_v0 = vld [vmem:[#allocation2] sm:$0x3]  ;;  %v343_v1 = vld [vmem:[#allocation5] sm:$0xff]  ;;  %vm157_vm0 = vcmask 254976  }
   0xf   :  { %v101_v2 = vld [vmem:[#allocation7] sm:$0x3]  ;;  %v77_v3 = vperm.slane %v343_v1, 0  ;;  %v61_v5 = vld [vmem:[#allocation2 + $0x2] sm:$0x3]  ;;  %v70_v6 = vrot.slane %v343_v1, 1 }
  0x10   :  { %v109_v4 = vand.u32 16777215, %v101_v2  ;;  %v102_v7 = vld [vmem:[#allocation7 + $0x2] sm:$0x3]  ;;  %v62_v8 = vld [vmem:[#allocation2 + $0x4] sm:$0x3] }
  0x11   :  { %v71_v9 = vrot.slane %v343_v1, 2  ;;  %v72_v10 = vrot.slane %v343_v1, 3  ;;  %v93_v11 = vadd.f32 %v77_v3, %v60_v0  ;;  %v78_v13 = vperm.slane %v70_v6, 0  ;;  %v103_v15 = vld [vmem:[#allocation7 + $0x4] sm:$0x3]  ;;  %s307_s0 = smov [#allocation8]  }
  0x12   :  { %v186_v12 = vxor.u32 2147483648, %v109_v4  ;;  %v110_v14 = vand.u32 16777215, %v102_v7  ;;  %v111_v17 = vand.u32 16777215, %v103_v15  ;;  %v73_v28 = vrot.slane %v343_v1, 4 }
  0x13   :  { %v79_v16 = vperm.slane %v71_v9, 0  ;;  %v63_v18 = vld [vmem:[#allocation2 + $0x6] sm:$0x3]  ;;  %v80_v19 = vperm.slane %v72_v10, 0  ;;  %v141_v20 = vmul.f32 1.1111112, %v93_v11  ;;  %v94_v21 = vadd.f32 %v78_v13, %v61_v5 }
  0x14   :  { %vm119_vm1 = vcmp.ge.s32.totalorder %v186_v12, 2149161370  ;;  %v187_v22 = vxor.u32 2147483648, %v110_v14  ;;  %v188_v24 = vxor.u32 2147483648, %v111_v17  ;;  %v104_v26 = vld [vmem:[#allocation7 + $0x6] sm:$0x3] }
  0x15   :  { %v95_v23 = vadd.f32 %v79_v16, %v62_v8  ;;  %v96_v25 = vadd.f32 %v80_v19, %v63_v18  ;;  %v64_v27 = vld [vmem:[#allocation2 + $0x8] sm:$0x3]  ;;  %v149_v29 = vsel %vm119_vm1, %v141_v20, 0.0  ;;  %v142_v30 = vmul.f32 1.1111112, %v94_v21  ;;  %s170_s2 = sshll.u32 %s307_s0, 4  ;;  %s171_s2 = int_to_ptr.vmem [resolvable:$true] %s170_s2 }
  0x16   :  { %vm122_vm2 = vcmp.ge.s32.totalorder %v187_v22, 2149161370  ;;  %v74_v31 = vrot.slane %v343_v1, 5  ;;  %158 = vst.msk [vmem:[#allocation8] sm:$0x3] %vm157_vm0, %v149_v29  ;;  %v81_v36 = vperm.slane %v73_v28, 0 }
  0x17   :  { %vm125_vm3 = vcmp.ge.s32.totalorder %v188_v24, 2149161370  ;;  %v143_v32 = vmul.f32 1.1111112, %v95_v23  ;;  %v150_v33 = vsel %vm122_vm2, %v142_v30, 0.0  ;;  %v75_v43 = vrot.slane %v343_v1, 6 }
  0x18   :  { %v112_v34 = vand.u32 16777215, %v104_v26  ;;  %v144_v35 = vmul.f32 1.1111112, %v96_v25  ;;  %159 = vst.msk [vmem:[#allocation8 + $0x2] sm:$0x3] %vm157_vm0, %v150_v33  ;;  %v97_v41 = vadd.f32 %v81_v36, %v64_v27 }
  0x19   :  { %v151_v37 = vsel %vm125_vm3, %v143_v32, 0.0  ;;  %v105_v38 = vld [vmem:[#allocation7 + $0x8] sm:$0x3]  ;;  %v82_v39 = vperm.slane %v74_v31, 0  ;;  %v65_v44 = vld [vmem:[#allocation2 + $0xa] sm:$0x3] }
  0x1a   :  { %160 = vst.msk [vmem:[#allocation8 + $0x4] sm:$0x3] %vm157_vm0, %v151_v37  ;;  %v189_v40 = vxor.u32 2147483648, %v112_v34  ;;  %v113_v42 = vand.u32 16777215, %v105_v38  ;;  %v83_v52 = vperm.slane %v75_v43, 0 }
  0x1b   :  { %v106_v45 = vld [vmem:[#allocation7 + $0xa] sm:$0x3]  ;;  %v66_v46 = vld [vmem:[#allocation2 + $0xc] sm:$0x3]  ;;  %v145_v48 = vmul.f32 1.1111112, %v97_v41  ;;  %v98_v49 = vadd.f32 %v82_v39, %v65_v44 }
  0x1c   :  { %vm128_vm4 = vcmp.ge.s32.totalorder %v189_v40, 2149161370  ;;  %v190_v47 = vxor.u32 2147483648, %v113_v42  ;;  %v114_v51 = vand.u32 16777215, %v106_v45  ;;  %v99_v57 = vadd.f32 %v83_v52, %v66_v46  ;;  %s172_s30 = sshll.u32 %s370_s3, 4  ;;  %s173_s30 = int_to_ptr.hbm [resolvable:$true] %s172_s30 }
  0x1d   :  { %v152_v50 = vsel %vm128_vm4, %v144_v35, 0.0  ;;  %v107_v53 = vld [vmem:[#allocation7 + $0xc] sm:$0x3]  ;;  %v146_v54 = vmul.f32 1.1111112, %v98_v49  ;;  %v76_v60 = vrot.slane %v343_v1, 7 }
  0x1e   :  { %161 = vst.msk [vmem:[#allocation8 + $0x6] sm:$0x3] %vm157_vm0, %v152_v50  ;;  %vm131_vm5 = vcmp.ge.s32.totalorder %v190_v47, 2149161370  ;;  %v191_v56 = vxor.u32 2147483648, %v114_v51 }
  0x1f   :  { %v153_v55 = vsel %vm131_vm5, %v145_v48, 0.0  ;;  %v115_v58 = vand.u32 16777215, %v107_v53  ;;  %v67_v59 = vld [vmem:[#allocation2 + $0xe] sm:$0x3]  ;;  %v84_v2 = vperm.slane %v76_v60, 0 }
  0x20   :  { %162 = vst.msk [vmem:[#allocation8 + $0x8] sm:$0x3] %vm157_vm0, %v153_v55  ;;  %v108_v61 = vld [vmem:[#allocation7 + $0xe] sm:$0x3]  ;;  %vm134_vm6 = vcmp.ge.s32.totalorder %v191_v56, 2149161370 }
  0x21   :  { %v192_v62 = vxor.u32 2147483648, %v115_v58  ;;  %v147_v63 = vmul.f32 1.1111112, %v99_v57  ;;  %v154_v0 = vsel %vm134_vm6, %v146_v54, 0.0  ;;  %v116_v3 = vand.u32 16777215, %v108_v61 }
  0x22   :  { %163 = vst.msk [vmem:[#allocation8 + $0xa] sm:$0x3] %vm157_vm0, %v154_v0  ;;  %v100_v5 = vadd.f32 %v84_v2, %v67_v59 }
  0x23   :  { %vm137_vm7 = vcmp.ge.s32.totalorder %v192_v62, 2149161370  ;;  %v193_v6 = vxor.u32 2147483648, %v116_v3 }
  0x24   :  { %v155_v4 = vsel %vm137_vm7, %v147_v63, 0.0  ;;  %v148_v1 = vmul.f32 1.1111112, %v100_v5 }
  0x25   :  { %164 = vst.msk [vmem:[#allocation8 + $0xc] sm:$0x3] %vm157_vm0, %v155_v4  ;;  %vm140_vm8 = vcmp.ge.s32.totalorder %v193_v6, 2149161370 }
  0x26   :  { %v156_v7 = vsel %vm140_vm8, %v148_v1, 0.0 }
  0x27   :  { %165 = vst.msk [vmem:[#allocation8 + $0xe] sm:$0x3] %vm157_vm0, %v156_v7 }
  0x28   :  { %178 = dma.vmem_to_hbm [thread:$0]  %s171_s2, 256, %s173_s30, [#allocation4], %s304_s22, %s304_s22, %s305_s23  }
  0x29   :  { %300 = dma.done.wait [#allocation4], 256  }
  0x2a   :  { %301 = vsyncadd [#allocation4], 4294967040 }
  0x2b   :  { %183 = vsyncpa [#allocation3], 1 }
  0x2c   :  { %184 = vsyncpa [#allocation6], 1 }
  0x2d   :  { %185 = vsyncpa [#allocation4], 1 }

</bundles_post_ra>
